<compile_context>
chip_gen: v7x
topology: tpu7x:2x2x1
jax: 0.10.0
libtpu: 0.0.40
codegen_flags: <defaults>
</compile_context>

<pallas_src>
import jax
import jax.numpy as jnp
from jax.experimental import pallas as pl
from jax.experimental.pallas import tpu as pltpu


def _round_up(v, m):
    return ((v + m - 1) // m) * m


def _pad_width(d):
    # Lane-dim padding: 128 for narrow layers; 256-granularity once the real width
    # exceeds 128 so the 2x 256x256 MXU on v6e/v7x is not fed half-empty columns.
    return 128 if d <= 128 else _round_up(d, 256)


def _mlp_kernel(x_ref, w1_ref, b1_ref, w2_ref, b2_ref, w3_ref, b3_ref, out_ref):
    # Weights are already [in, out]: contraction is on the last dim of both operands,
    # so each jnp.dot lowers straight to the MXU with no in-kernel transpose.
    x = x_ref[...]                                               # bf16 [TM, DIN_P]

    # L1: x @ W1t + b1, ReLU (f32 epilogue, then back to bf16 for the MXU)
    g1 = jnp.dot(x, w1_ref[...], preferred_element_type=jnp.float32) + b1_ref[...]
    h1 = jnp.maximum(g1, 0.0).astype(x_ref.dtype)

    # L2: h1 @ W2t + b2, ReLU
    g2 = jnp.dot(h1, w2_ref[...], preferred_element_type=jnp.float32) + b2_ref[...]
    h2 = jnp.maximum(g2, 0.0).astype(x_ref.dtype)

    # L3: h2 @ W3t + b3
    y = jnp.dot(h2, w3_ref[...], preferred_element_type=jnp.float32) + b3_ref[...]

    out_ref[...] = y.astype(out_ref.dtype)                       # bf16 store (lane-dense)


def prepare_params(params, *, compute_dtype=jnp.bfloat16):
    """One-time preprocessing (hoisted out of the forward pass).

    Transposes weights to [in, out], zero-pads to lane-dense shapes and casts to the MXU
    compute dtype.  Zero-padded columns give ReLU(0)=0 hidden lanes and zero weight rows
    downstream, so padding never pollutes the real outputs.
    """
    w1, b1 = params["w1"], params["b1"]
    w2, b2 = params["w2"], params["b2"]
    w3, b3 = params["w3"], params["b3"]
    n, din = w1.shape
    dout = w3.shape[0]
    din_p, n_p, dout_p = _pad_width(din), _pad_width(n), _pad_width(dout)

    def pad2(a, r, c):
        return jnp.pad(a, ((0, r - a.shape[0]), (0, c - a.shape[1])))

    return {
        "w1t": pad2(w1.T, din_p, n_p).astype(compute_dtype),
        "w2t": pad2(w2.T, n_p, n_p).astype(compute_dtype),
        "w3t": pad2(w3.T, n_p, dout_p).astype(compute_dtype),
        # Biases as f32 [1, out_pad] rows (f32 epilogue, v5e-safe).
        "b1r": pad2(b1.reshape(1, -1).astype(jnp.float32), 1, n_p),
        "b2r": pad2(b2.reshape(1, -1).astype(jnp.float32), 1, n_p),
        "b3r": pad2(b3.reshape(1, -1).astype(jnp.float32), 1, dout_p),
        "dims": (din, n, dout, din_p, n_p, dout_p),
        "compute_dtype": compute_dtype,
    }


def fully_connected_net(x, params, *, tm=256):
    """Forward pass of FullyConnectedNet.

    x: [B, din] float32
    params: raw dict (w1 [n,din], b1 [n], w2 [n,n], b2 [n], w3 [dout,n], b3 [dout])
            or the output of prepare_params().
    returns: [B, dout] in x.dtype
    """
    if "w1t" not in params:
        params = prepare_params(params)

    compute_dtype = params["compute_dtype"]
    din, n, dout, din_p, n_p, dout_p = params["dims"]
    B = x.shape[0]
    assert x.shape[1] == din

    # --- batch tiling: pad only to the pack granularity, not to tm ------------------
    pack = 8 * (4 // jnp.dtype(compute_dtype).itemsize)          # 16 for bf16, 8 for f32
    b_p = _round_up(B, pack)
    tm = max(pack, (min(tm, b_p) // pack) * pack)
    # v7x has 2 TensorCores: expose >=2 grid steps on the "parallel" batch axis when the
    # batch is large enough (no cost on v5e/v6e which have a single TC).
    if b_p <= tm and b_p >= 2 * pack:
        tm = _round_up(b_p // 2, pack)
    grid = (pl.cdiv(b_p, tm),)

    x_p = jnp.pad(x, ((0, b_p - B), (0, din_p - din))).astype(compute_dtype)

    # --- VMEM budget / cost estimate -------------------------------------------------
    itm = jnp.dtype(compute_dtype).itemsize
    weight_keys = ("w1t", "b1r", "w2t", "b2r", "w3t", "b3r")
    weight_bytes = sum(params[k].size * params[k].dtype.itemsize for k in weight_keys)
    io_tile_bytes = tm * din_p * itm + tm * dout_p * itm         # one x tile + one out tile
    scratch_bytes = 2 * tm * n_p * 4                             # f32 intermediates (g/h)
    footprint = weight_bytes + 2 * io_tile_bytes + scratch_bytes # residents 1x, x/out 2x
    vmem_limit_bytes = int(min(max(2 * footprint, 16 * 2**20), 64 * 2**20))

    flops = 2 * b_p * (din_p * n_p + n_p * n_p + n_p * dout_p)
    bytes_accessed = (
        x_p.size * x_p.dtype.itemsize + weight_bytes + b_p * dout_p * itm
    )

    def build(resident_pipeline_mode):
        if resident_pipeline_mode is None:
            resident = lambda a: pl.BlockSpec(a.shape, lambda i: (0, 0))
        else:
            resident = lambda a: pl.BlockSpec(
                a.shape, lambda i: (0, 0), pipeline_mode=resident_pipeline_mode)
        return pl.pallas_call(
            _mlp_kernel,
            out_shape=jax.ShapeDtypeStruct((b_p, dout_p), compute_dtype),
            grid=grid,
            in_specs=[
                pl.BlockSpec((tm, din_p), lambda i: (i, 0)),     # x tiled over batch
                resident(params["w1t"]), resident(params["b1r"]),
                resident(params["w2t"]), resident(params["b2r"]),
                resident(params["w3t"]), resident(params["b3r"]),
            ],
            out_specs=pl.BlockSpec((tm, dout_p), lambda i: (i, 0)),
            compiler_params=pltpu.CompilerParams(
                dimension_semantics=("parallel",),
                vmem_limit_bytes=vmem_limit_bytes,
            ),
            cost_estimate=pl.CostEstimate(
                flops=flops, transcendentals=0, bytes_accessed=bytes_accessed),
        )

    args = (x_p, params["w1t"], params["b1r"], params["w2t"], params["b2r"],
            params["w3t"], params["b3r"])
    try:
        # Weight-stationary operands never change block index -> single-buffer them so the
        # resident footprint is not doubled (matters on v7x's 64 MiB VMEM).
        y_p = build(pl.Buffered(1))(*args)
    except Exception:
        # Fallback for Pallas builds that reject single-buffering: default pipelining.
        y_p = build(None)(*args)

    # Slice back to the logical (unpadded) output and upcast to the input dtype.
    return y_p[:B, :dout].astype(x.dtype)


def init_params(key, din=4, dout=3, n=8):
    """Deterministic init matching the PyTorch module: uniform(-0.1, 0.1)."""
    ks = jax.random.split(key, 6)
    u = lambda k, shape: jax.random.uniform(k, shape, jnp.float32, -0.1, 0.1)
    return {
        "w1": u(ks[0], (n, din)), "b1": u(ks[1], (n,)),
        "w2": u(ks[2], (n, n)),   "b2": u(ks[3], (n,)),
        "w3": u(ks[4], (dout, n)), "b3": u(ks[5], (dout,)),
    }


def _reference_forward(x, p):
    g1 = x @ p["w1"].T + p["b1"][None, :]
    h1 = jnp.maximum(g1, 0.0)
    g2 = h1 @ p["w2"].T + p["b2"][None, :]
    h2 = jnp.maximum(g2, 0.0)
    return h2 @ p["w3"].T + p["b3"][None, :]


if __name__ == "__main__":
    key = jax.random.PRNGKey(0)
    k_x, k_p = jax.random.split(key)

    din, dout, n = 4, 3, 8
    batch = 2

    x = jax.random.normal(k_x, (batch, din), dtype=jnp.float32)
    params = init_params(k_p, din=din, dout=dout, n=n)

    # Weight preprocessing is done once here (not per forward call).
    prepared = prepare_params(params)

    y = fully_connected_net(x, prepared)
    y = jax.block_until_ready(y)

    y_ref = _reference_forward(x, params)
    assert y.shape == (batch, dout)
    # bf16 MXU operands with f32 accumulation: tolerance reflects bf16 input rounding.
    assert jnp.allclose(y, y_ref, atol=2e-2, rtol=2e-2)

    print("KERNEL_OK")
</pallas_src>

<mosaic_0001>
module attributes {stable_mosaic.version = 11 : i64} {
  func.func @_mlp_kernel(%arg0: i32, %arg1: memref<16x128xbf16, #tpu.memory_space<vmem>>, %arg2: memref<128x128xbf16, #tpu.memory_space<vmem>>, %arg3: memref<1x128xf32, #tpu.memory_space<vmem>>, %arg4: memref<128x128xbf16, #tpu.memory_space<vmem>>, %arg5: memref<1x128xf32, #tpu.memory_space<vmem>>, %arg6: memref<128x128xbf16, #tpu.memory_space<vmem>>, %arg7: memref<1x128xf32, #tpu.memory_space<vmem>>, %arg8: memref<16x128xbf16, #tpu.memory_space<vmem>>) attributes {dimension_semantics = [#tpu.dimension_semantics<parallel>], iteration_bounds = array<i64: 1>, scalar_prefetch = 0 : i64, scratch_operands = 0 : i64, tpu.core_type = #tpu.core_type<tc>, window_params = [{transform_indices = @transform_0, window_bounds = array<i64: 16, 128>}, {pipeline_mode = #tpu.pipeline_mode<synchronous>, transform_indices = @transform_1, window_bounds = array<i64: 128, 128>}, {pipeline_mode = #tpu.pipeline_mode<synchronous>, transform_indices = @transform_2, window_bounds = array<i64: 1, 128>}, {pipeline_mode = #tpu.pipeline_mode<synchronous>, transform_indices = @transform_3, window_bounds = array<i64: 128, 128>}, {pipeline_mode = #tpu.pipeline_mode<synchronous>, transform_indices = @transform_4, window_bounds = array<i64: 1, 128>}, {pipeline_mode = #tpu.pipeline_mode<synchronous>, transform_indices = @transform_5, window_bounds = array<i64: 128, 128>}, {pipeline_mode = #tpu.pipeline_mode<synchronous>, transform_indices = @transform_6, window_bounds = array<i64: 1, 128>}, {transform_indices = @transform_7, window_bounds = array<i64: 16, 128>}]} {
    %c0 = arith.constant 0 : index
    %c0_0 = arith.constant 0 : index
    %0 = vector.load %arg1[%c0, %c0_0] : memref<16x128xbf16, #tpu.memory_space<vmem>>, vector<16x128xbf16>
    %c0_1 = arith.constant 0 : index
    %c0_2 = arith.constant 0 : index
    %1 = vector.load %arg2[%c0_1, %c0_2] : memref<128x128xbf16, #tpu.memory_space<vmem>>, vector<128x128xbf16>
    %cst = arith.constant dense<0.000000e+00> : vector<16x128xf32>
    %2 = tpu.matmul %0, %1, %cst {dimension_numbers = #tpu.dot_dimension_numbers<[1], [0], [0], [1], [0, 0, 1, 1], [], []>} : vector<16x128xbf16>, vector<128x128xbf16>, vector<16x128xf32> -> vector<16x128xf32>
    %c0_3 = arith.constant 0 : index
    %c0_4 = arith.constant 0 : index
    %3 = vector.load %arg3[%c0_3, %c0_4] : memref<1x128xf32, #tpu.memory_space<vmem>>, vector<1x128xf32>
    %4 = vector.broadcast %3 : vector<1x128xf32> to vector<16x128xf32>
    %5 = arith.addf %2, %4 : vector<16x128xf32>
    %cst_5 = arith.constant 0.000000e+00 : f32
    %6 = vector.broadcast %cst_5 : f32 to vector<16x128xf32>
    %7 = arith.maximumf %5, %6 : vector<16x128xf32>
    %8 = arith.truncf %7 : vector<16x128xf32> to vector<16x128xbf16>
    %c0_6 = arith.constant 0 : index
    %c0_7 = arith.constant 0 : index
    %9 = vector.load %arg4[%c0_6, %c0_7] : memref<128x128xbf16, #tpu.memory_space<vmem>>, vector<128x128xbf16>
    %cst_8 = arith.constant dense<0.000000e+00> : vector<16x128xf32>
    %10 = tpu.matmul %8, %9, %cst_8 {dimension_numbers = #tpu.dot_dimension_numbers<[1], [0], [0], [1], [0, 0, 1, 1], [], []>} : vector<16x128xbf16>, vector<128x128xbf16>, vector<16x128xf32> -> vector<16x128xf32>
    %c0_9 = arith.constant 0 : index
    %c0_10 = arith.constant 0 : index
    %11 = vector.load %arg5[%c0_9, %c0_10] : memref<1x128xf32, #tpu.memory_space<vmem>>, vector<1x128xf32>
    %12 = vector.broadcast %11 : vector<1x128xf32> to vector<16x128xf32>
    %13 = arith.addf %10, %12 : vector<16x128xf32>
    %cst_11 = arith.constant 0.000000e+00 : f32
    %14 = vector.broadcast %cst_11 : f32 to vector<16x128xf32>
    %15 = arith.maximumf %13, %14 : vector<16x128xf32>
    %16 = arith.truncf %15 : vector<16x128xf32> to vector<16x128xbf16>
    %c0_12 = arith.constant 0 : index
    %c0_13 = arith.constant 0 : index
    %17 = vector.load %arg6[%c0_12, %c0_13] : memref<128x128xbf16, #tpu.memory_space<vmem>>, vector<128x128xbf16>
    %cst_14 = arith.constant dense<0.000000e+00> : vector<16x128xf32>
    %18 = tpu.matmul %16, %17, %cst_14 {dimension_numbers = #tpu.dot_dimension_numbers<[1], [0], [0], [1], [0, 0, 1, 1], [], []>} : vector<16x128xbf16>, vector<128x128xbf16>, vector<16x128xf32> -> vector<16x128xf32>
    %c0_15 = arith.constant 0 : index
    %c0_16 = arith.constant 0 : index
    %19 = vector.load %arg7[%c0_15, %c0_16] : memref<1x128xf32, #tpu.memory_space<vmem>>, vector<1x128xf32>
    %20 = vector.broadcast %19 : vector<1x128xf32> to vector<16x128xf32>
    %21 = arith.addf %18, %20 : vector<16x128xf32>
    %22 = arith.truncf %21 : vector<16x128xf32> to vector<16x128xbf16>
    %c0_17 = arith.constant 0 : index
    %c0_18 = arith.constant 0 : index
    %23 = vector.load %arg8[%c0_17, %c0_18] : memref<16x128xbf16, #tpu.memory_space<vmem>>, vector<16x128xbf16>
    tpu.vector_store %arg8[%c0_17, %c0_18], %22 {strides = array<i32>} : memref<16x128xbf16, #tpu.memory_space<vmem>>, vector<16x128xbf16>,
    return
  }
  func.func @transform_0(%arg0: i32) -> (i32, i32) {
    %c0_i32 = arith.constant 0 : i32
    %c0_i32_0 = arith.constant 0 : i32
    return %arg0, %c0_i32 : i32, i32
  }
  func.func @transform_1(%arg0: i32) -> (i32, i32) {
    %c0_i32 = arith.constant 0 : i32
    %c0_i32_0 = arith.constant 0 : i32
    %c0_i32_1 = arith.constant 0 : i32
    return %c0_i32, %c0_i32_0 : i32, i32
  }
  func.func @transform_2(%arg0: i32) -> (i32, i32) {
    %c0_i32 = arith.constant 0 : i32
    %c0_i32_0 = arith.constant 0 : i32
    %c0_i32_1 = arith.constant 0 : i32
    return %c0_i32, %c0_i32_0 : i32, i32
  }
  func.func @transform_3(%arg0: i32) -> (i32, i32) {
    %c0_i32 = arith.constant 0 : i32
    %c0_i32_0 = arith.constant 0 : i32
    %c0_i32_1 = arith.constant 0 : i32
    return %c0_i32, %c0_i32_0 : i32, i32
  }
  func.func @transform_4(%arg0: i32) -> (i32, i32) {
    %c0_i32 = arith.constant 0 : i32
    %c0_i32_0 = arith.constant 0 : i32
    %c0_i32_1 = arith.constant 0 : i32
    return %c0_i32, %c0_i32_0 : i32, i32
  }
  func.func @transform_5(%arg0: i32) -> (i32, i32) {
    %c0_i32 = arith.constant 0 : i32
    %c0_i32_0 = arith.constant 0 : i32
    %c0_i32_1 = arith.constant 0 : i32
    return %c0_i32, %c0_i32_0 : i32, i32
  }
  func.func @transform_6(%arg0: i32) -> (i32, i32) {
    %c0_i32 = arith.constant 0 : i32
    %c0_i32_0 = arith.constant 0 : i32
    %c0_i32_1 = arith.constant 0 : i32
    return %c0_i32, %c0_i32_0 : i32, i32
  }
  func.func @transform_7(%arg0: i32) -> (i32, i32) {
    %c0_i32 = arith.constant 0 : i32
    %c0_i32_0 = arith.constant 0 : i32
    return %arg0, %c0_i32 : i32, i32
  }
}

module attributes {stable_mosaic.version = 11 : i64} {
  func.func @_mlp_kernel(%arg0: i32, %arg1: memref<16x128xbf16, #tpu.memory_space<vmem>>, %arg2: memref<128x128xbf16, #tpu.memory_space<vmem>>, %arg3: memref<1x128xf32, #tpu.memory_space<vmem>>, %arg4: memref<128x128xbf16, #tpu.memory_space<vmem>>, %arg5: memref<1x128xf32, #tpu.memory_space<vmem>>, %arg6: memref<128x128xbf16, #tpu.memory_space<vmem>>, %arg7: memref<1x128xf32, #tpu.memory_space<vmem>>, %arg8: memref<16x128xbf16, #tpu.memory_space<vmem>>) attributes {dimension_semantics = [#tpu.dimension_semantics<parallel>], iteration_bounds = array<i64: 1>, scalar_prefetch = 0 : i64, scratch_operands = 0 : i64, tpu.core_type = #tpu.core_type<tc>, window_params = [{transform_indices = @transform_0, window_bounds = array<i64: 16, 128>}, {pipeline_mode = #tpu.pipeline_mode<synchronous>, transform_indices = @transform_1, window_bounds = array<i64: 128, 128>}, {pipeline_mode = #tpu.pipeline_mode<synchronous>, transform_indices = @transform_2, window_bounds = array<i64: 1, 128>}, {pipeline_mode = #tpu.pipeline_mode<synchronous>, transform_indices = @transform_3, window_bounds = array<i64: 128, 128>}, {pipeline_mode = #tpu.pipeline_mode<synchronous>, transform_indices = @transform_4, window_bounds = array<i64: 1, 128>}, {pipeline_mode = #tpu.pipeline_mode<synchronous>, transform_indices = @transform_5, window_bounds = array<i64: 128, 128>}, {pipeline_mode = #tpu.pipeline_mode<synchronous>, transform_indices = @transform_6, window_bounds = array<i64: 1, 128>}, {transform_indices = @transform_7, window_bounds = array<i64: 16, 128>}]} {
    %c0 = arith.constant 0 : index
    %c0_0 = arith.constant 0 : index
    %0 = vector.load %arg1[%c0, %c0_0] : memref<16x128xbf16, #tpu.memory_space<vmem>>, vector<16x128xbf16>
    %c0_1 = arith.constant 0 : index
    %c0_2 = arith.constant 0 : index
    %1 = vector.load %arg2[%c0_1, %c0_2] : memref<128x128xbf16, #tpu.memory_space<vmem>>, vector<128x128xbf16>
    %cst = arith.constant dense<0.000000e+00> : vector<16x128xf32>
    %2 = tpu.matmul %0, %1, %cst {dimension_numbers = #tpu.dot_dimension_numbers<[1], [0], [0], [1], [0, 0, 1, 1], [], []>} : vector<16x128xbf16>, vector<128x128xbf16>, vector<16x128xf32> -> vector<16x128xf32>
    %c0_3 = arith.constant 0 : index
    %c0_4 = arith.constant 0 : index
    %3 = vector.load %arg3[%c0_3, %c0_4] : memref<1x128xf32, #tpu.memory_space<vmem>>, vector<1x128xf32>
    %4 = vector.broadcast %3 : vector<1x128xf32> to vector<16x128xf32>
    %5 = arith.addf %2, %4 : vector<16x128xf32>
    %cst_5 = arith.constant 0.000000e+00 : f32
    %6 = vector.broadcast %cst_5 : f32 to vector<16x128xf32>
    %7 = arith.maximumf %5, %6 : vector<16x128xf32>
    %8 = arith.truncf %7 : vector<16x128xf32> to vector<16x128xbf16>
    %c0_6 = arith.constant 0 : index
    %c0_7 = arith.constant 0 : index
    %9 = vector.load %arg4[%c0_6, %c0_7] : memref<128x128xbf16, #tpu.memory_space<vmem>>, vector<128x128xbf16>
    %cst_8 = arith.constant dense<0.000000e+00> : vector<16x128xf32>
    %10 = tpu.matmul %8, %9, %cst_8 {dimension_numbers = #tpu.dot_dimension_numbers<[1], [0], [0], [1], [0, 0, 1, 1], [], []>} : vector<16x128xbf16>, vector<128x128xbf16>, vector<16x128xf32> -> vector<16x128xf32>
    %c0_9 = arith.constant 0 : index
    %c0_10 = arith.constant 0 : index
    %11 = vector.load %arg5[%c0_9, %c0_10] : memref<1x128xf32, #tpu.memory_space<vmem>>, vector<1x128xf32>
    %12 = vector.broadcast %11 : vector<1x128xf32> to vector<16x128xf32>
    %13 = arith.addf %10, %12 : vector<16x128xf32>
    %cst_11 = arith.constant 0.000000e+00 : f32
    %14 = vector.broadcast %cst_11 : f32 to vector<16x128xf32>
    %15 = arith.maximumf %13, %14 : vector<16x128xf32>
    %16 = arith.truncf %15 : vector<16x128xf32> to vector<16x128xbf16>
    %c0_12 = arith.constant 0 : index
    %c0_13 = arith.constant 0 : index
    %17 = vector.load %arg6[%c0_12, %c0_13] : memref<128x128xbf16, #tpu.memory_space<vmem>>, vector<128x128xbf16>
    %cst_14 = arith.constant dense<0.000000e+00> : vector<16x128xf32>
    %18 = tpu.matmul %16, %17, %cst_14 {dimension_numbers = #tpu.dot_dimension_numbers<[1], [0], [0], [1], [0, 0, 1, 1], [], []>} : vector<16x128xbf16>, vector<128x128xbf16>, vector<16x128xf32> -> vector<16x128xf32>
    %c0_15 = arith.constant 0 : index
    %c0_16 = arith.constant 0 : index
    %19 = vector.load %arg7[%c0_15, %c0_16] : memref<1x128xf32, #tpu.memory_space<vmem>>, vector<1x128xf32>
    %20 = vector.broadcast %19 : vector<1x128xf32> to vector<16x128xf32>
    %21 = arith.addf %18, %20 : vector<16x128xf32>
    %22 = arith.truncf %21 : vector<16x128xf32> to vector<16x128xbf16>
    %c0_17 = arith.constant 0 : index
    %c0_18 = arith.constant 0 : index
    %23 = vector.load %arg8[%c0_17, %c0_18] : memref<16x128xbf16, #tpu.memory_space<vmem>>, vector<16x128xbf16>
    tpu.vector_store %arg8[%c0_17, %c0_18], %22 {strides = array<i32>} : memref<16x128xbf16, #tpu.memory_space<vmem>>, vector<16x128xbf16>,
    return
  }
  func.func @transform_0(%arg0: i32) -> (i32, i32) {
    %c0_i32 = arith.constant 0 : i32
    %c0_i32_0 = arith.constant 0 : i32
    return %arg0, %c0_i32 : i32, i32
  }
  func.func @transform_1(%arg0: i32) -> (i32, i32) {
    %c0_i32 = arith.constant 0 : i32
    %c0_i32_0 = arith.constant 0 : i32
    %c0_i32_1 = arith.constant 0 : i32
    return %c0_i32, %c0_i32_0 : i32, i32
  }
  func.func @transform_2(%arg0: i32) -> (i32, i32) {
    %c0_i32 = arith.constant 0 : i32
    %c0_i32_0 = arith.constant 0 : i32
    %c0_i32_1 = arith.constant 0 : i32
    return %c0_i32, %c0_i32_0 : i32, i32
  }
  func.func @transform_3(%arg0: i32) -> (i32, i32) {
    %c0_i32 = arith.constant 0 : i32
    %c0_i32_0 = arith.constant 0 : i32
    %c0_i32_1 = arith.constant 0 : i32
    return %c0_i32, %c0_i32_0 : i32, i32
  }
  func.func @transform_4(%arg0: i32) -> (i32, i32) {
    %c0_i32 = arith.constant 0 : i32
    %c0_i32_0 = arith.constant 0 : i32
    %c0_i32_1 = arith.constant 0 : i32
    return %c0_i32, %c0_i32_0 : i32, i32
  }
  func.func @transform_5(%arg0: i32) -> (i32, i32) {
    %c0_i32 = arith.constant 0 : i32
    %c0_i32_0 = arith.constant 0 : i32
    %c0_i32_1 = arith.constant 0 : i32
    return %c0_i32, %c0_i32_0 : i32, i32
  }
  func.func @transform_6(%arg0: i32) -> (i32, i32) {
    %c0_i32 = arith.constant 0 : i32
    %c0_i32_0 = arith.constant 0 : i32
    %c0_i32_1 = arith.constant 0 : i32
    return %c0_i32, %c0_i32_0 : i32, i32
  }
  func.func @transform_7(%arg0: i32) -> (i32, i32) {
    %c0_i32 = arith.constant 0 : i32
    %c0_i32_0 = arith.constant 0 : i32
    return %arg0, %c0_i32 : i32, i32
  }
}

</mosaic_0001>

<bundles_post_ra>
// kernel: tpu_custom_call.1
= control target key start
LH: loop header
LB: loop body
LE: loop exit
PB: predicated region body
PF: predicated region fallthrough
CT: control target
= control target key end

     0   :  { %12 = vsyncpa [#allocation3], 0  ;;  %s915_s0 = inlined_call_operand.hbm [shape: bf16[16,128], index: 0, kind: input, shape index: {}]   ;;  %s916_s1 = inlined_call_operand.hbm [shape: bf16[128,128], index: 1, kind: input, shape index: {}]   ;;  %s917_s2 = inlined_call_operand.vmem [shape: f32[1,128], index: 2, kind: input, shape index: {}]   ;;  %s918_s3 = inlined_call_operand.hbm [shape: bf16[128,128], index: 3, kind: input, shape index: {}]   ;;  %s919_s4 = inlined_call_operand.vmem [shape: f32[1,128], index: 4, kind: input, shape index: {}]   ;;  %s920_s5 = inlined_call_operand.hbm [shape: bf16[128,128], index: 5, kind: input, shape index: {}]   ;;  %s921_s6 = inlined_call_operand.vmem [shape: f32[1,128], index: 6, kind: input, shape index: {}]   ;;  %s922_s7 = inlined_call_operand.hbm [shape: bf16[16,128], index: 7, kind: output, shape index: {}]  }
   0x1   :  { %13 = vsyncpa [#allocation6], 0 }
   0x2   :  { %14 = vsyncpa [#allocation9], 0 }
   0x3   :  { %15 = vsyncpa [#allocation4], 0  ;;  %s738_s24 = smov [#allocation5]   ;;  %s739_s26 = smov [#allocation2]  }
   0x4   :  { %s33_s25 = sshll.u32 %s738_s24, 4  ;;  %s21_s27 = sshll.u32 %s739_s26, 4  ;;  %s34_s25 = int_to_ptr.vmem [resolvable:$true] %s33_s25  ;;  %s787_s27 = int_to_ptr.vmem [resolvable:$true] %s21_s27 }
   0x5   :  { %s620_s30 = scalar_lea.hbm %s916_s1, 1024 }
   0x6   :  { %p621_p0 = scmp.ne.s32.totalorder %s916_s1, %s620_s30  ;;  %p624_p1 = scmp.lt.u32.totalorder %s620_s30, %s916_s1 }
   0x8   :  { %p626_p2 = pnand %p624_p1, %p621_p0 }
   0xa   :  { %629 = shalt.err (!%p626_p2)
}
   0xb   :  { %s630_s12 = scalar_lea.vmem %s34_s25, 1024  ;;  %p635_p4 = scmp.lt.s32.totalorder %s34_s25, %s34_s25 }
   0xc   :  { %p631_p3 = scmp.ne.s32.totalorder %s34_s25, %s630_s12  ;;  %p636_p5 = scmp.lt.s32.totalorder %s630_s12, %s630_s12 }
   0xe   :  { %p637_p6 = por %p636_p5, %p635_p4 }
  0x10   :  { %p638_p7 = pnand %p637_p6, %p631_p3 }
  0x12   :  { %641 = shalt.err (!%p638_p7)
}
  0x13   :  { %s740_s13 = smov 64   ;;  %s741_s14 = smov 4  }
  0x14   :  { %39 = dma.hbm_to_vmem [thread:$0]  %s916_s1, 1024, %s34_s25, [#allocation6], %s740_s13, %s740_s13, %s741_s14  }
  0x15   :  { %s642_s19 = scalar_lea.hbm %s915_s0, 128 }
  0x16   :  { %p643_p8 = scmp.ne.s32.totalorder %s915_s0, %s642_s19  ;;  %p646_p9 = scmp.lt.u32.totalorder %s642_s19, %s915_s0 }
  0x18   :  { %p648_p10 = pnand %p646_p9, %p643_p8 }
  0x1a   :  { %651 = shalt.err (!%p648_p10)
}
  0x1b   :  { %s652_s24 = scalar_lea.vmem %s787_s27, 128  ;;  %p657_p12 = scmp.lt.s32.totalorder %s787_s27, %s787_s27 }
  0x1c   :  { %p653_p11 = scmp.ne.s32.totalorder %s787_s27, %s652_s24  ;;  %p658_p13 = scmp.lt.s32.totalorder %s652_s24, %s652_s24 }
  0x1e   :  { %p659_p0 = por %p658_p13, %p657_p12 }
  0x20   :  { %p660_p1 = pnand %p659_p0, %p653_p11 }
  0x22   :  { %663 = shalt.err (!%p660_p1)
}
  0x23   :  { %27 = dma.hbm_to_vmem [thread:$0]  %s915_s0, 128, %s787_s27, [#allocation3], %s740_s13, %s740_s13, %s741_s14  }
  0x24   :  { %s742_s26 = smov [#allocation7]   ;;  %s743_s29 = smov [#allocation8]  }
  0x25   :  { %s47_s28 = sshll.u32 %s742_s26, 4  ;;  %s61_s30 = sshll.u32 %s743_s29, 4  ;;  %s48_s28 = int_to_ptr.vmem [resolvable:$true] %s47_s28  ;;  %s824_s30 = int_to_ptr.vmem [resolvable:$true] %s61_s30 }
  0x26   :  { %s664_s10 = scalar_lea.hbm %s918_s3, 1024 }
  0x27   :  { %p665_p2 = scmp.ne.s32.totalorder %s918_s3, %s664_s10  ;;  %p668_p3 = scmp.lt.u32.totalorder %s664_s10, %s918_s3 }
  0x29   :  { %p670_p4 = pnand %p668_p3, %p665_p2 }
  0x2b   :  { %673 = shalt.err (!%p670_p4)
}
  0x2c   :  { %s674_s0 = scalar_lea.vmem %s48_s28, 1024  ;;  %p679_p6 = scmp.lt.s32.totalorder %s48_s28, %s48_s28 }
  0x2d   :  { %p675_p5 = scmp.ne.s32.totalorder %s48_s28, %s674_s0  ;;  %p680_p7 = scmp.lt.s32.totalorder %s674_s0, %s674_s0 }
  0x2f   :  { %p681_p8 = por %p680_p7, %p679_p6 }
  0x31   :  { %p682_p9 = pnand %p681_p8, %p675_p5 }
  0x33   :  { %685 = shalt.err (!%p682_p9)
}
  0x34   :  { %53 = dma.hbm_to_vmem [thread:$0]  %s918_s3, 1024, %s48_s28, [#allocation6], %s740_s13, %s740_s13, %s741_s14  }
  0x35   :  { %s686_s20 = scalar_lea.hbm %s920_s5, 1024 }
  0x36   :  { %p687_p10 = scmp.ne.s32.totalorder %s920_s5, %s686_s20  ;;  %p690_p11 = scmp.lt.u32.totalorder %s686_s20, %s920_s5 }
  0x38   :  { %p692_p12 = pnand %p690_p11, %p687_p10 }
  0x3a   :  { %695 = shalt.err (!%p692_p12)
}
  0x3b   :  { %s696_s1 = scalar_lea.vmem %s824_s30, 1024  ;;  %p701_p0 = scmp.lt.s32.totalorder %s824_s30, %s824_s30 }
  0x3c   :  { %p697_p13 = scmp.ne.s32.totalorder %s824_s30, %s696_s1  ;;  %p702_p1 = scmp.lt.s32.totalorder %s696_s1, %s696_s1 }
  0x3e   :  { %p703_p2 = por %p702_p1, %p701_p0 }
  0x40   :  { %p704_p3 = pnand %p703_p2, %p697_p13 }
  0x42   :  { %707 = shalt.err (!%p704_p3)
}
  0x43   :  { %67 = dma.hbm_to_vmem [thread:$0]  %s920_s5, 1024, %s824_s30, [#allocation9], %s740_s13, %s740_s13, %s741_s14  }
  0x44   :  { %730 = dma.done.wait [#allocation3], 128  }
  0x45   :  { %731 = vsyncadd [#allocation3], 4294967168 }
  0x46   :  { %732 = dma.done.wait [#allocation6], 2048  }
  0x47   :  { %733 = vsyncadd [#allocation6], 4294965248 }
  0x48   :  { %734 = dma.done.wait [#allocation9], 1024  }
  0x49   :  { %735 = vsyncadd [#allocation9], 4294966272  ;;  %v744_v0 = vmov 0.0   ;;  %vm745_vm0 = vmmov 0   ;;  %v595_v1 = vld [vmem:[#allocation5] sm:$0xff]   ;;  %v596_v2 = vld [vmem:[#allocation5 + $0x8] sm:$0xff]  }
  0x4a   :  { %526 = vmatprep.subr.bf16.mxu0 %v744_v0  ;;  %542 = vmatprep.mubr.msk.bf16.mxu0 %vm745_vm0, %v744_v0  ;;  %v597_v3 = vld [vmem:[#allocation5 + $0x10] sm:$0xff]   ;;  %v604_v4 = vld [vmem:[#allocation7] sm:$0xff]   ;;  %v598_v5 = vld [vmem:[#allocation5 + $0x18] sm:$0xff]   ;;  %s746_s8 = smov [#allocation10]  }
  0x4b   :  { %546 = vmatprep.subr.bf16.mxu1 %v744_v0  ;;  %562 = vmatprep.mubr.msk.bf16.mxu1 %vm745_vm0, %v744_v0  ;;  %v605_v6 = vld [vmem:[#allocation7 + $0x8] sm:$0xff]   ;;  %v599_v7 = vld [vmem:[#allocation5 + $0x20] sm:$0xff]   ;;  %v606_v8 = vld [vmem:[#allocation7 + $0x10] sm:$0xff]   ;;  %s448_s9 = sshll.u32 %s746_s8, 4  ;;  %s449_s9 = int_to_ptr.vmem [resolvable:$true] %s448_s9 }
  0x4c   :  { %527 = vmatpush3.bf16.msra.mxu0 %v595_v1  ;;  %547 = vmatpush3.bf16.msra.mxu1 %v604_v4  ;;  %v600_v9 = vld [vmem:[#allocation5 + $0x28] sm:$0xff]   ;;  %v607_v10 = vld [vmem:[#allocation7 + $0x18] sm:$0xff]   ;;  %v601_v11 = vld [vmem:[#allocation5 + $0x30] sm:$0xff]   ;;  %p713_p5 = scmp.lt.s32.totalorder %s449_s9, %s449_s9 }
  0x4d   :  { %528 = vmatprep.subr.bf16.mxu0 %v744_v0  ;;  %548 = vmatprep.subr.bf16.mxu1 %v744_v0  ;;  %v608_v12 = vld [vmem:[#allocation7 + $0x20] sm:$0xff]   ;;  %v602_v13 = vld [vmem:[#allocation5 + $0x38] sm:$0xff]   ;;  %v609_v14 = vld [vmem:[#allocation7 + $0x28] sm:$0xff]  }
  0x4e   :  { %v603_v15 = vld [vmem:[#allocation2] sm:$0xff]   ;;  %v610_v16 = vld [vmem:[#allocation7 + $0x30] sm:$0xff]   ;;  %v612_v18 = vld [vmem:[#allocation8] sm:$0xff]  }
  0x4f   :  { %v611_v17 = vld [vmem:[#allocation7 + $0x38] sm:$0xff]   ;;  %v613_v19 = vld [vmem:[#allocation8 + $0x8] sm:$0xff]   ;;  %v614_v20 = vld [vmem:[#allocation8 + $0x10] sm:$0xff]  }
  0x50   :  { %529 = vmatpush3.bf16.msra.mxu0 %v596_v2  ;;  %549 = vmatpush3.bf16.msra.mxu1 %v605_v6  ;;  %v615_v21 = vld [vmem:[#allocation8 + $0x18] sm:$0xff]   ;;  %v616_v22 = vld [vmem:[#allocation8 + $0x20] sm:$0xff]   ;;  %v617_v23 = vld [vmem:[#allocation8 + $0x28] sm:$0xff]  }
  0x51   :  { %530 = vmatprep.subr.bf16.mxu0 %v744_v0  ;;  %550 = vmatprep.subr.bf16.mxu1 %v744_v0  ;;  %v462_v24 = vld [vmem:[%s917_s2] ss:$0 sm:$0xff]  ;;  %v618_v34 = vld [vmem:[#allocation8 + $0x30] sm:$0xff]  }
  0x52   :  { %v619_v35 = vld [vmem:[#allocation8 + $0x38] sm:$0xff]  }
  0x53   :  { %v472_v36 = vld [vmem:[%s919_s4] ss:$0 sm:$0xff]  ;;  %s708_s4 = scalar_lea.vmem %s449_s9, 128 }
  0x54   :  { %531 = vmatpush3.bf16.msra.mxu0 %v597_v3  ;;  %551 = vmatpush3.bf16.msra.mxu1 %v606_v8  ;;  %v481_v46 = vld [vmem:[%s921_s6] ss:$0 sm:$0xff]  ;;  %p709_p4 = scmp.ne.s32.totalorder %s449_s9, %s708_s4  ;;  %p714_p6 = scmp.lt.s32.totalorder %s708_s4, %s708_s4 }
  0x55   :  { %532 = vmatprep.subr.bf16.mxu0 %v744_v0  ;;  %552 = vmatprep.subr.bf16.mxu1 %v744_v0 }
  0x56   :  { %p715_p7 = por %p714_p6, %p713_p5 }
  0x58   :  { %533 = vmatpush3.bf16.msra.mxu0 %v598_v5  ;;  %553 = vmatpush3.bf16.msra.mxu1 %v607_v10  ;;  %p716_p8 = pnand %p715_p7, %p709_p4 }
  0x59   :  { %534 = vmatprep.subr.bf16.mxu0 %v744_v0  ;;  %554 = vmatprep.subr.bf16.mxu1 %v744_v0 }
  0x5c   :  { %535 = vmatpush3.bf16.msra.mxu0 %v599_v7  ;;  %555 = vmatpush3.bf16.msra.mxu1 %v608_v12 }
  0x5d   :  { %536 = vmatprep.subr.bf16.mxu0 %v744_v0  ;;  %556 = vmatprep.subr.bf16.mxu1 %v744_v0 }
  0x60   :  { %537 = vmatpush3.bf16.msra.mxu0 %v600_v9  ;;  %557 = vmatpush3.bf16.msra.mxu1 %v609_v14 }
  0x61   :  { %538 = vmatprep.subr.bf16.mxu0 %v744_v0  ;;  %558 = vmatprep.subr.bf16.mxu1 %v744_v0 }
  0x64   :  { %539 = vmatpush3.bf16.msra.mxu0 %v601_v11  ;;  %559 = vmatpush3.bf16.msra.mxu1 %v610_v16 }
  0x65   :  { %540 = vmatprep.subr.bf16.mxu0 %v744_v0  ;;  %560 = vmatprep.subr.bf16.mxu1 %v744_v0 }
  0x68   :  { %541 = vmatpush3.bf16.msra.mxu0 %v602_v13  ;;  %561 = vmatpush3.bf16.msra.mxu1 %v611_v17 }
  0x69   :  { %566 = vmatprep.subr.bf16.mxu0 %v744_v0 }
  0x6b   :  { %543 = vmatmul.mubr.bf16.vlgmr.msra.gmra.mrb[0].mxu0 %v603_v15 }
  0x6c   :  { %582 = vmatprep.mubr.msk.bf16.mxu0 %vm745_vm0, %v744_v0  ;;  %567 = vmatpush3.bf16.msra.mxu0 %v612_v18 }
  0x6d   :  { %568 = vmatprep.subr.bf16.mxu0 %v744_v0 }
  0x70   :  { %569 = vmatpush3.bf16.msra.mxu0 %v613_v19 }
  0x71   :  { %570 = vmatprep.subr.bf16.mxu0 %v744_v0 }
  0x74   :  { %571 = vmatpush3.bf16.msra.mxu0 %v614_v20 }
  0x75   :  { %572 = vmatprep.subr.bf16.mxu0 %v744_v0 }
  0x78   :  { %573 = vmatpush3.bf16.msra.mxu0 %v615_v21 }
  0x79   :  { %574 = vmatprep.subr.bf16.mxu0 %v744_v0 }
  0x7c   :  { %575 = vmatpush3.bf16.msra.mxu0 %v616_v22 }
  0x7d   :  { %576 = vmatprep.subr.bf16.mxu0 %v744_v0 }
  0x80   :  { %577 = vmatpush3.bf16.msra.mxu0 %v617_v23 }
  0x81   :  { %578 = vmatprep.subr.bf16.mxu0 %v744_v0 }
  0x84   :  { %579 = vmatpush3.bf16.msra.mxu0 %v618_v34 }
  0x85   :  { %580 = vmatprep.subr.bf16.mxu0 %v744_v0 }
  0x88   :  { %581 = vmatpush3.bf16.msra.mxu0 %v619_v35 }
 0x13e   :  { %v196_v25 = vpop.f32.mrb[0].mxu0 }
 0x13f   :  { %v197_v26 = vadd.f32 %v462_v24, %v196_v25  ;;  %v544_v27 = vpop.f32.mrb[1].mxu0 }
 0x140   :  { %v199_v28 = vpop.f32.mrb[2].mxu0 }
 0x141   :  { %v200_v29 = vadd.f32 %v462_v24, %v199_v28  ;;  %v545_v30 = vpop.f32.mrb[3].mxu0  ;;  %v203_v31 = vmax.f32 %v197_v26, 0.0 }
 0x143   :  { %v204_v32 = vmax.f32 %v200_v29, 0.0 }
 0x145   :  { %v205_v33 = vpack.c.bf16 %v204_v32, %v203_v31 }
 0x147   :  { %563 = vmatmul.mubr.bf16.vlgmr.msra.gmra.mrb[0].mxu1 %v205_v33 }
 0x21a   :  { %v311_v37 = vpop.f32.mrb[0].mxu1 }
 0x21b   :  { %v312_v38 = vadd.f32 %v472_v36, %v311_v37  ;;  %v564_v39 = vpop.f32.mrb[1].mxu1 }
 0x21c   :  { %v314_v40 = vpop.f32.mrb[2].mxu1 }
 0x21d   :  { %v315_v41 = vadd.f32 %v472_v36, %v314_v40  ;;  %v565_v42 = vpop.f32.mrb[3].mxu1  ;;  %v318_v43 = vmax.f32 %v312_v38, 0.0 }
 0x21f   :  { %v319_v44 = vmax.f32 %v315_v41, 0.0 }
 0x221   :  { %v320_v45 = vpack.c.bf16 %v319_v44, %v318_v43 }
 0x223   :  { %583 = vmatmul.mubr.bf16.vlgmr.msra.gmra.mrb[4].mxu0 %v320_v45 }
 0x2f6   :  { %v426_v47 = vpop.f32.mrb[4].mxu0 }
 0x2f7   :  { %v584_v48 = vpop.f32.mrb[5].mxu0  ;;  %v427_v50 = vadd.f32 %v481_v46, %v426_v47 }
 0x2f8   :  { %v429_v49 = vpop.f32.mrb[6].mxu0 }
 0x2f9   :  { %v430_v51 = vadd.f32 %v481_v46, %v429_v49  ;;  %v585_v52 = vpop.f32.mrb[7].mxu0 }
 0x2fb   :  { %v497_v53 = vpack.c.bf16 %v430_v51, %v427_v50 }
 0x2fd   :  { %498 = vst [vmem:[#allocation10] sm:$0xff] %v497_v53  }
 0x2fe   :  { %719 = shalt.err (!%p716_p8)
}
 0x2ff   :  { %s720_s11 = scalar_lea.hbm %s922_s7, 128 }
 0x300   :  { %p721_p9 = scmp.ne.s32.totalorder %s922_s7, %s720_s11  ;;  %p724_p10 = scmp.lt.u32.totalorder %s720_s11, %s922_s7 }
 0x302   :  { %p726_p11 = pnand %p724_p10, %p721_p9 }
 0x304   :  { %729 = shalt.err (!%p726_p11)
}
 0x305   :  { %454 = dma.vmem_to_hbm [thread:$0]  %s449_s9, 128, %s922_s7, [#allocation4], %s740_s13, %s740_s13, %s741_s14  }
 0x306   :  { %736 = dma.done.wait [#allocation4], 128  }
 0x307   :  { %737 = vsyncadd [#allocation4], 4294967168 }
 0x308   :  { %458 = vsyncpa [#allocation3], 1 }
 0x309   :  { %459 = vsyncpa [#allocation6], 1 }
 0x30a   :  { %460 = vsyncpa [#allocation9], 1 }
 0x30b   :  { %461 = vsyncpa [#allocation4], 1 }

// kernel: tpu_custom_call.1
= control target key start
LH: loop header
LB: loop body
LE: loop exit
PB: predicated region body
PF: predicated region fallthrough
CT: control target
= control target key end

     0   :  { %12 = vsyncpa [#allocation3], 0  ;;  %s915_s0 = inlined_call_operand.hbm [shape: bf16[16,128], index: 0, kind: input, shape index: {}]   ;;  %s916_s1 = inlined_call_operand.hbm [shape: bf16[128,128], index: 1, kind: input, shape index: {}]   ;;  %s917_s2 = inlined_call_operand.vmem [shape: f32[1,128], index: 2, kind: input, shape index: {}]   ;;  %s918_s3 = inlined_call_operand.hbm [shape: bf16[128,128], index: 3, kind: input, shape index: {}]   ;;  %s919_s4 = inlined_call_operand.vmem [shape: f32[1,128], index: 4, kind: input, shape index: {}]   ;;  %s920_s5 = inlined_call_operand.hbm [shape: bf16[128,128], index: 5, kind: input, shape index: {}]   ;;  %s921_s6 = inlined_call_operand.vmem [shape: f32[1,128], index: 6, kind: input, shape index: {}]   ;;  %s922_s7 = inlined_call_operand.hbm [shape: bf16[16,128], index: 7, kind: output, shape index: {}]  }
   0x1   :  { %13 = vsyncpa [#allocation6], 0 }
   0x2   :  { %14 = vsyncpa [#allocation9], 0 }
   0x3   :  { %15 = vsyncpa [#allocation4], 0  ;;  %s738_s24 = smov [#allocation5]   ;;  %s739_s26 = smov [#allocation2]  }
   0x4   :  { %s33_s25 = sshll.u32 %s738_s24, 4  ;;  %s21_s27 = sshll.u32 %s739_s26, 4  ;;  %s34_s25 = int_to_ptr.vmem [resolvable:$true] %s33_s25  ;;  %s787_s27 = int_to_ptr.vmem [resolvable:$true] %s21_s27 }
   0x5   :  { %s620_s30 = scalar_lea.hbm %s916_s1, 1024 }
   0x6   :  { %p621_p0 = scmp.ne.s32.totalorder %s916_s1, %s620_s30  ;;  %p624_p1 = scmp.lt.u32.totalorder %s620_s30, %s916_s1 }
   0x8   :  { %p626_p2 = pnand %p624_p1, %p621_p0 }
   0xa   :  { %629 = shalt.err (!%p626_p2)
}
   0xb   :  { %s630_s12 = scalar_lea.vmem %s34_s25, 1024  ;;  %p635_p4 = scmp.lt.s32.totalorder %s34_s25, %s34_s25 }
   0xc   :  { %p631_p3 = scmp.ne.s32.totalorder %s34_s25, %s630_s12  ;;  %p636_p5 = scmp.lt.s32.totalorder %s630_s12, %s630_s12 }
   0xe   :  { %p637_p6 = por %p636_p5, %p635_p4 }
  0x10   :  { %p638_p7 = pnand %p637_p6, %p631_p3 }
  0x12   :  { %641 = shalt.err (!%p638_p7)
}
  0x13   :  { %s740_s13 = smov 64   ;;  %s741_s14 = smov 4  }
  0x14   :  { %39 = dma.hbm_to_vmem [thread:$0]  %s916_s1, 1024, %s34_s25, [#allocation6], %s740_s13, %s740_s13, %s741_s14  }
  0x15   :  { %s642_s19 = scalar_lea.hbm %s915_s0, 128 }
  0x16   :  { %p643_p8 = scmp.ne.s32.totalorder %s915_s0, %s642_s19  ;;  %p646_p9 = scmp.lt.u32.totalorder %s642_s19, %s915_s0 }
  0x18   :  { %p648_p10 = pnand %p646_p9, %p643_p8 }
  0x1a   :  { %651 = shalt.err (!%p648_p10)
}
  0x1b   :  { %s652_s24 = scalar_lea.vmem %s787_s27, 128  ;;  %p657_p12 = scmp.lt.s32.totalorder %s787_s27, %s787_s27 }
  0x1c   :  { %p653_p11 = scmp.ne.s32.totalorder %s787_s27, %s652_s24  ;;  %p658_p13 = scmp.lt.s32.totalorder %s652_s24, %s652_s24 }
  0x1e   :  { %p659_p0 = por %p658_p13, %p657_p12 }
  0x20   :  { %p660_p1 = pnand %p659_p0, %p653_p11 }
  0x22   :  { %663 = shalt.err (!%p660_p1)
}
  0x23   :  { %27 = dma.hbm_to_vmem [thread:$0]  %s915_s0, 128, %s787_s27, [#allocation3], %s740_s13, %s740_s13, %s741_s14  }
  0x24   :  { %s742_s26 = smov [#allocation7]   ;;  %s743_s29 = smov [#allocation8]  }
  0x25   :  { %s47_s28 = sshll.u32 %s742_s26, 4  ;;  %s61_s30 = sshll.u32 %s743_s29, 4  ;;  %s48_s28 = int_to_ptr.vmem [resolvable:$true] %s47_s28  ;;  %s824_s30 = int_to_ptr.vmem [resolvable:$true] %s61_s30 }
  0x26   :  { %s664_s10 = scalar_lea.hbm %s918_s3, 1024 }
  0x27   :  { %p665_p2 = scmp.ne.s32.totalorder %s918_s3, %s664_s10  ;;  %p668_p3 = scmp.lt.u32.totalorder %s664_s10, %s918_s3 }
  0x29   :  { %p670_p4 = pnand %p668_p3, %p665_p2 }
  0x2b   :  { %673 = shalt.err (!%p670_p4)
}
  0x2c   :  { %s674_s0 = scalar_lea.vmem %s48_s28, 1024  ;;  %p679_p6 = scmp.lt.s32.totalorder %s48_s28, %s48_s28 }
  0x2d   :  { %p675_p5 = scmp.ne.s32.totalorder %s48_s28, %s674_s0  ;;  %p680_p7 = scmp.lt.s32.totalorder %s674_s0, %s674_s0 }
  0x2f   :  { %p681_p8 = por %p680_p7, %p679_p6 }
  0x31   :  { %p682_p9 = pnand %p681_p8, %p675_p5 }
  0x33   :  { %685 = shalt.err (!%p682_p9)
}
  0x34   :  { %53 = dma.hbm_to_vmem [thread:$0]  %s918_s3, 1024, %s48_s28, [#allocation6], %s740_s13, %s740_s13, %s741_s14  }
  0x35   :  { %s686_s20 = scalar_lea.hbm %s920_s5, 1024 }
  0x36   :  { %p687_p10 = scmp.ne.s32.totalorder %s920_s5, %s686_s20  ;;  %p690_p11 = scmp.lt.u32.totalorder %s686_s20, %s920_s5 }
  0x38   :  { %p692_p12 = pnand %p690_p11, %p687_p10 }
  0x3a   :  { %695 = shalt.err (!%p692_p12)
}
  0x3b   :  { %s696_s1 = scalar_lea.vmem %s824_s30, 1024  ;;  %p701_p0 = scmp.lt.s32.totalorder %s824_s30, %s824_s30 }
  0x3c   :  { %p697_p13 = scmp.ne.s32.totalorder %s824_s30, %s696_s1  ;;  %p702_p1 = scmp.lt.s32.totalorder %s696_s1, %s696_s1 }
  0x3e   :  { %p703_p2 = por %p702_p1, %p701_p0 }
  0x40   :  { %p704_p3 = pnand %p703_p2, %p697_p13 }
  0x42   :  { %707 = shalt.err (!%p704_p3)
}
  0x43   :  { %67 = dma.hbm_to_vmem [thread:$0]  %s920_s5, 1024, %s824_s30, [#allocation9], %s740_s13, %s740_s13, %s741_s14  }
  0x44   :  { %730 = dma.done.wait [#allocation3], 128  }
  0x45   :  { %731 = vsyncadd [#allocation3], 4294967168 }
  0x46   :  { %732 = dma.done.wait [#allocation6], 2048  }
  0x47   :  { %733 = vsyncadd [#allocation6], 4294965248 }
  0x48   :  { %734 = dma.done.wait [#allocation9], 1024  }
  0x49   :  { %735 = vsyncadd [#allocation9], 4294966272  ;;  %v744_v0 = vmov 0.0   ;;  %vm745_vm0 = vmmov 0   ;;  %v595_v1 = vld [vmem:[#allocation5] sm:$0xff]   ;;  %v596_v2 = vld [vmem:[#allocation5 + $0x8] sm:$0xff]  }
  0x4a   :  { %526 = vmatprep.subr.bf16.mxu0 %v744_v0  ;;  %542 = vmatprep.mubr.msk.bf16.mxu0 %vm745_vm0, %v744_v0  ;;  %v597_v3 = vld [vmem:[#allocation5 + $0x10] sm:$0xff]   ;;  %v604_v4 = vld [vmem:[#allocation7] sm:$0xff]   ;;  %v598_v5 = vld [vmem:[#allocation5 + $0x18] sm:$0xff]   ;;  %s746_s8 = smov [#allocation10]  }
  0x4b   :  { %546 = vmatprep.subr.bf16.mxu1 %v744_v0  ;;  %562 = vmatprep.mubr.msk.bf16.mxu1 %vm745_vm0, %v744_v0  ;;  %v605_v6 = vld [vmem:[#allocation7 + $0x8] sm:$0xff]   ;;  %v599_v7 = vld [vmem:[#allocation5 + $0x20] sm:$0xff]   ;;  %v606_v8 = vld [vmem:[#allocation7 + $0x10] sm:$0xff]   ;;  %s448_s9 = sshll.u32 %s746_s8, 4  ;;  %s449_s9 = int_to_ptr.vmem [resolvable:$true] %s448_s9 }
  0x4c   :  { %527 = vmatpush3.bf16.msra.mxu0 %v595_v1  ;;  %547 = vmatpush3.bf16.msra.mxu1 %v604_v4  ;;  %v600_v9 = vld [vmem:[#allocation5 + $0x28] sm:$0xff]   ;;  %v607_v10 = vld [vmem:[#allocation7 + $0x18] sm:$0xff]   ;;  %v601_v11 = vld [vmem:[#allocation5 + $0x30] sm:$0xff]   ;;  %p713_p5 = scmp.lt.s32.totalorder %s449_s9, %s449_s9 }
  0x4d   :  { %528 = vmatprep.subr.bf16.mxu0 %v744_v0  ;;  %548 = vmatprep.subr.bf16.mxu1 %v744_v0  ;;  %v608_v12 = vld [vmem:[#allocation7 + $0x20] sm:$0xff]   ;;  %v602_v13 = vld [vmem:[#allocation5 + $0x38] sm:$0xff]   ;;  %v609_v14 = vld [vmem:[#allocation7 + $0x28] sm:$0xff]  }
  0x4e   :  { %v603_v15 = vld [vmem:[#allocation2] sm:$0xff]   ;;  %v610_v16 = vld [vmem:[#allocation7 + $0x30] sm:$0xff]   ;;  %v612_v18 = vld [vmem:[#allocation8] sm:$0xff]  }
  0x4f   :  { %v611_v17 = vld [vmem:[#allocation7 + $0x38] sm:$0xff]   ;;  %v613_v19 = vld [vmem:[#allocation8 + $0x8] sm:$0xff]   ;;  %v614_v20 = vld [vmem:[#allocation8 + $0x10] sm:$0xff]  }
  0x50   :  { %529 = vmatpush3.bf16.msra.mxu0 %v596_v2  ;;  %549 = vmatpush3.bf16.msra.mxu1 %v605_v6  ;;  %v615_v21 = vld [vmem:[#allocation8 + $0x18] sm:$0xff]   ;;  %v616_v22 = vld [vmem:[#allocation8 + $0x20] sm:$0xff]   ;;  %v617_v23 = vld [vmem:[#allocation8 + $0x28] sm:$0xff]  }
  0x51   :  { %530 = vmatprep.subr.bf16.mxu0 %v744_v0  ;;  %550 = vmatprep.subr.bf16.mxu1 %v744_v0  ;;  %v462_v24 = vld [vmem:[%s917_s2] ss:$0 sm:$0xff]  ;;  %v618_v34 = vld [vmem:[#allocation8 + $0x30] sm:$0xff]  }
  0x52   :  { %v619_v35 = vld [vmem:[#allocation8 + $0x38] sm:$0xff]  }
  0x53   :  { %v472_v36 = vld [vmem:[%s919_s4] ss:$0 sm:$0xff]  ;;  %s708_s4 = scalar_lea.vmem %s449_s9, 128 }
  0x54   :  { %531 = vmatpush3.bf16.msra.mxu0 %v597_v3  ;;  %551 = vmatpush3.bf16.msra.mxu1 %v606_v8  ;;  %v481_v46 = vld [vmem:[%s921_s6] ss:$0 sm:$0xff]  ;;  %p709_p4 = scmp.ne.s32.totalorder %s449_s9, %s708_s4  ;;  %p714_p6 = scmp.lt.s32.totalorder %s708_s4, %s708_s4 }
  0x55   :  { %532 = vmatprep.subr.bf16.mxu0 %v744_v0  ;;  %552 = vmatprep.subr.bf16.mxu1 %v744_v0 }
  0x56   :  { %p715_p7 = por %p714_p6, %p713_p5 }
  0x58   :  { %533 = vmatpush3.bf16.msra.mxu0 %v598_v5  ;;  %553 = vmatpush3.bf16.msra.mxu1 %v607_v10  ;;  %p716_p8 = pnand %p715_p7, %p709_p4 }
  0x59   :  { %534 = vmatprep.subr.bf16.mxu0 %v744_v0  ;;  %554 = vmatprep.subr.bf16.mxu1 %v744_v0 }
  0x5c   :  { %535 = vmatpush3.bf16.msra.mxu0 %v599_v7  ;;  %555 = vmatpush3.bf16.msra.mxu1 %v608_v12 }
  0x5d   :  { %536 = vmatprep.subr.bf16.mxu0 %v744_v0  ;;  %556 = vmatprep.subr.bf16.mxu1 %v744_v0 }
  0x60   :  { %537 = vmatpush3.bf16.msra.mxu0 %v600_v9  ;;  %557 = vmatpush3.bf16.msra.mxu1 %v609_v14 }
  0x61   :  { %538 = vmatprep.subr.bf16.mxu0 %v744_v0  ;;  %558 = vmatprep.subr.bf16.mxu1 %v744_v0 }
  0x64   :  { %539 = vmatpush3.bf16.msra.mxu0 %v601_v11  ;;  %559 = vmatpush3.bf16.msra.mxu1 %v610_v16 }
  0x65   :  { %540 = vmatprep.subr.bf16.mxu0 %v744_v0  ;;  %560 = vmatprep.subr.bf16.mxu1 %v744_v0 }
  0x68   :  { %541 = vmatpush3.bf16.msra.mxu0 %v602_v13  ;;  %561 = vmatpush3.bf16.msra.mxu1 %v611_v17 }
  0x69   :  { %566 = vmatprep.subr.bf16.mxu0 %v744_v0 }
  0x6b   :  { %543 = vmatmul.mubr.bf16.vlgmr.msra.gmra.mrb[0].mxu0 %v603_v15 }
  0x6c   :  { %582 = vmatprep.mubr.msk.bf16.mxu0 %vm745_vm0, %v744_v0  ;;  %567 = vmatpush3.bf16.msra.mxu0 %v612_v18 }
  0x6d   :  { %568 = vmatprep.subr.bf16.mxu0 %v744_v0 }
  0x70   :  { %569 = vmatpush3.bf16.msra.mxu0 %v613_v19 }
  0x71   :  { %570 = vmatprep.subr.bf16.mxu0 %v744_v0 }
  0x74   :  { %571 = vmatpush3.bf16.msra.mxu0 %v614_v20 }
  0x75   :  { %572 = vmatprep.subr.bf16.mxu0 %v744_v0 }
  0x78   :  { %573 = vmatpush3.bf16.msra.mxu0 %v615_v21 }
  0x79   :  { %574 = vmatprep.subr.bf16.mxu0 %v744_v0 }
  0x7c   :  { %575 = vmatpush3.bf16.msra.mxu0 %v616_v22 }
  0x7d   :  { %576 = vmatprep.subr.bf16.mxu0 %v744_v0 }
  0x80   :  { %577 = vmatpush3.bf16.msra.mxu0 %v617_v23 }
  0x81   :  { %578 = vmatprep.subr.bf16.mxu0 %v744_v0 }
  0x84   :  { %579 = vmatpush3.bf16.msra.mxu0 %v618_v34 }
  0x85   :  { %580 = vmatprep.subr.bf16.mxu0 %v744_v0 }
  0x88   :  { %581 = vmatpush3.bf16.msra.mxu0 %v619_v35 }
 0x13e   :  { %v196_v25 = vpop.f32.mrb[0].mxu0 }
 0x13f   :  { %v197_v26 = vadd.f32 %v462_v24, %v196_v25  ;;  %v544_v27 = vpop.f32.mrb[1].mxu0 }
 0x140   :  { %v199_v28 = vpop.f32.mrb[2].mxu0 }
 0x141   :  { %v200_v29 = vadd.f32 %v462_v24, %v199_v28  ;;  %v545_v30 = vpop.f32.mrb[3].mxu0  ;;  %v203_v31 = vmax.f32 %v197_v26, 0.0 }
 0x143   :  { %v204_v32 = vmax.f32 %v200_v29, 0.0 }
 0x145   :  { %v205_v33 = vpack.c.bf16 %v204_v32, %v203_v31 }
 0x147   :  { %563 = vmatmul.mubr.bf16.vlgmr.msra.gmra.mrb[0].mxu1 %v205_v33 }
 0x21a   :  { %v311_v37 = vpop.f32.mrb[0].mxu1 }
 0x21b   :  { %v312_v38 = vadd.f32 %v472_v36, %v311_v37  ;;  %v564_v39 = vpop.f32.mrb[1].mxu1 }
 0x21c   :  { %v314_v40 = vpop.f32.mrb[2].mxu1 }
 0x21d   :  { %v315_v41 = vadd.f32 %v472_v36, %v314_v40  ;;  %v565_v42 = vpop.f32.mrb[3].mxu1  ;;  %v318_v43 = vmax.f32 %v312_v38, 0.0 }
 0x21f   :  { %v319_v44 = vmax.f32 %v315_v41, 0.0 }
 0x221   :  { %v320_v45 = vpack.c.bf16 %v319_v44, %v318_v43 }
 0x223   :  { %583 = vmatmul.mubr.bf16.vlgmr.msra.gmra.mrb[4].mxu0 %v320_v45 }
 0x2f6   :  { %v426_v47 = vpop.f32.mrb[4].mxu0 }
 0x2f7   :  { %v584_v48 = vpop.f32.mrb[5].mxu0  ;;  %v427_v50 = vadd.f32 %v481_v46, %v426_v47 }
 0x2f8   :  { %v429_v49 = vpop.f32.mrb[6].mxu0 }
 0x2f9   :  { %v430_v51 = vadd.f32 %v481_v46, %v429_v49  ;;  %v585_v52 = vpop.f32.mrb[7].mxu0 }
 0x2fb   :  { %v497_v53 = vpack.c.bf16 %v430_v51, %v427_v50 }
 0x2fd   :  { %498 = vst [vmem:[#allocation10] sm:$0xff] %v497_v53  }
 0x2fe   :  { %719 = shalt.err (!%p716_p8)
}
 0x2ff   :  { %s720_s11 = scalar_lea.hbm %s922_s7, 128 }
 0x300   :  { %p721_p9 = scmp.ne.s32.totalorder %s922_s7, %s720_s11  ;;  %p724_p10 = scmp.lt.u32.totalorder %s720_s11, %s922_s7 }
 0x302   :  { %p726_p11 = pnand %p724_p10, %p721_p9 }
 0x304   :  { %729 = shalt.err (!%p726_p11)
}
 0x305   :  { %454 = dma.vmem_to_hbm [thread:$0]  %s449_s9, 128, %s922_s7, [#allocation4], %s740_s13, %s740_s13, %s741_s14  }
 0x306   :  { %736 = dma.done.wait [#allocation4], 128  }
 0x307   :  { %737 = vsyncadd [#allocation4], 4294967168 }
 0x308   :  { %458 = vsyncpa [#allocation3], 1 }
 0x309   :  { %459 = vsyncpa [#allocation6], 1 }
 0x30a   :  { %460 = vsyncpa [#allocation9], 1 }
 0x30b   :  { %461 = vsyncpa [#allocation4], 1 }

</bundles_post_ra>
